<compile_context>
chip_gen: v5e
topology: v5e:2x2
jax: 0.10.0
libtpu: 0.0.40
codegen_flags: <defaults>
</compile_context>

<pallas_src>
import jax
import jax.numpy as jnp
from jax.experimental import pallas as pl
from jax.experimental.pallas import tpu as pltpu

# ----------------------------- configuration -------------------------------
BATCH = 8
STATE_DIM = 16
HIDDEN_DIM = 32
PHYSICS_DIM = 40          # divisible by the 5 constraint types -> head dim 8
NUM_LAYERS = 3
CONSTRAINT_TYPES = ("energy", "momentum", "collision", "boundary", "continuity")
PROJ_SPECS = (("position", 3), ("velocity", 3), ("force", 3),
              ("energy", 1), ("momentum", 3))
CONSTRAINT_DIM = PHYSICS_DIM // len(CONSTRAINT_TYPES)
PROJ_TOTAL = sum(d for _, d in PROJ_SPECS)
LN_EPS = 1e-5

# --------------------------- static slab layout ------------------------------
_LAYER_IN = (STATE_DIM,) + (HIDDEN_DIM,) * (NUM_LAYERS - 1)
BIAS_ROWS = 3 * NUM_LAYERS                       # b, gamma, beta per layer
BIAS_PAD = -(-BIAS_ROWS // 8) * 8                # 16: keep W blocks 8-aligned
W_ROW_STARTS = tuple(BIAS_PAD + sum(_LAYER_IN[:i]) for i in range(NUM_LAYERS))
MLP_SLAB_ROWS = BIAS_PAD + sum(_LAYER_IN)        # 96
OUT_COLS = PHYSICS_DIM + PHYSICS_DIM + PROJ_TOTAL  # enc | combined | proj = 93
OUT_PAD = 128                                    # lane-dense output slab
FIN_SLAB_ROWS = -(-(HIDDEN_DIM + 1) // 8) * 8    # 40 (W_final rows + bias row)


# --------------------------- fused forward kernel ---------------------------
def physics_encoder_kernel(x_ref, mlp_ref, fin_ref, out_ref):
    h = x_ref[...]                                            # (B, STATE_DIM)
    inv_h = 1.0 / HIDDEN_DIM
    for li in range(NUM_LAYERS):
        r0 = W_ROW_STARTS[li]
        din = _LAYER_IN[li]
        w = mlp_ref[r0:r0 + din, :]                           # (din, H)
        b = mlp_ref[3 * li + 0:3 * li + 1, :]                 # (1, H)
        g = mlp_ref[3 * li + 1:3 * li + 2, :]                 # (1, H)
        bt = mlp_ref[3 * li + 2:3 * li + 3, :]                # (1, H)
        # Linear -> ReLU
        h = jnp.dot(h, w, preferred_element_type=jnp.float32) + b
        h = jnp.maximum(h, 0.0)
        # LayerNorm, single-pass moments (both reductions issue back-to-back)
        s1 = jnp.sum(h, axis=-1, keepdims=True)
        s2 = jnp.sum(h * h, axis=-1, keepdims=True)
        mu = s1 * inv_h
        var = jnp.maximum(s2 * inv_h - mu * mu, 0.0)
        h = (h - mu) * jax.lax.rsqrt(var + LN_EPS) * g + bt
        # Dropout(0.1): identity in eval/inference mode.
    # Folded epilogue: one lane-dense matmul produces enc|combined|proj slab.
    wf = fin_ref[0:HIDDEN_DIM, :]                             # (H, 128)
    bf = fin_ref[HIDDEN_DIM:HIDDEN_DIM + 1, :]                # (1, 128)
    out_ref[...] = jnp.dot(h, wf, preferred_element_type=jnp.float32) + bf


# --------------------- one-time parameter repacking -------------------------
def prepare_params(p):
    """Pack PyTorch-layout params into two lane-dense slabs (run once)."""
    hp = jax.lax.Precision.HIGHEST

    # --- MLP slab: [bias/gamma/beta rows | W0^T | W1^T | W2^T] ---
    slab_mlp = jnp.zeros((MLP_SLAB_ROWS, HIDDEN_DIM), jnp.float32)
    for i in range(NUM_LAYERS):
        slab_mlp = slab_mlp.at[3 * i + 0].set(p[f"enc_b{i}"])
        slab_mlp = slab_mlp.at[3 * i + 1].set(p[f"ln_g{i}"])
        slab_mlp = slab_mlp.at[3 * i + 2].set(p[f"ln_b{i}"])
        r0, din = W_ROW_STARTS[i], _LAYER_IN[i]
        slab_mlp = slab_mlp.at[r0:r0 + din].set(jnp.asarray(p[f"enc_w{i}"]).T)

    # --- Folded epilogue slab ---
    wf = jnp.asarray(p["enc_wf"]).T                            # (H, P)
    bf = jnp.asarray(p["enc_bf"])                              # (P,)
    wc = jnp.concatenate([p[f"head_w_{ct}"] for ct in CONSTRAINT_TYPES], axis=0).T
    bc = jnp.concatenate([p[f"head_b_{ct}"] for ct in CONSTRAINT_TYPES], axis=0)
    wp = jnp.concatenate([p[f"proj_w_{n}"] for n, _ in PROJ_SPECS], axis=0).T
    bp = jnp.concatenate([p[f"proj_b_{n}"] for n, _ in PROJ_SPECS], axis=0)
    w_final = jnp.concatenate(
        [wf, jnp.dot(wf, wc, precision=hp), jnp.dot(wf, wp, precision=hp)], axis=1)
    b_final = jnp.concatenate(
        [bf, jnp.dot(bf, wc, precision=hp) + bc, jnp.dot(bf, wp, precision=hp) + bp])
    slab_final = jnp.zeros((FIN_SLAB_ROWS, OUT_PAD), jnp.float32)
    slab_final = slab_final.at[:HIDDEN_DIM, :OUT_COLS].set(w_final)
    slab_final = slab_final.at[HIDDEN_DIM, :OUT_COLS].set(b_final)
    return slab_mlp, slab_final


# ------------------------------- forward ------------------------------------
@jax.jit
def physics_encoder_forward(state, slab_mlp, slab_final):
    """Fused Pallas forward. Slabs come from prepare_params()."""
    B = state.shape[0]
    vmem = pl.BlockSpec(memory_space=pltpu.MemorySpace.VMEM)
    slab = pl.pallas_call(
        physics_encoder_kernel,
        out_shape=jax.ShapeDtypeStruct((B, OUT_PAD), jnp.float32),
        in_specs=[vmem, vmem, vmem],
        out_specs=vmem,
    )(state, slab_mlp, slab_final)

    # Cheap slices of the lane-dense slab -> output dictionary.
    # TODO(synk): constraint_mask implemented for the default (None = all
    # constraints); a static mask would only change which slices are returned.
    outputs = {"encoding": slab[:, :PHYSICS_DIM]}
    comb = slab[:, PHYSICS_DIM:2 * PHYSICS_DIM]
    for i, ct in enumerate(CONSTRAINT_TYPES):
        outputs[f"{ct}_features"] = comb[:, i * CONSTRAINT_DIM:(i + 1) * CONSTRAINT_DIM]
    outputs["combined_constraints"] = comb
    off = 2 * PHYSICS_DIM
    for name, d in PROJ_SPECS:
        outputs[name] = slab[:, off:off + d]
        off += d
    return outputs


# --------------------------- pure-JAX reference ------------------------------
def reference_forward(state, p):
    with jax.default_matmul_precision("highest"):
        h = state
        for i in range(NUM_LAYERS):
            h = jnp.maximum(h @ p[f"enc_w{i}"].T + p[f"enc_b{i}"], 0.0)
            mu = h.mean(-1, keepdims=True)
            var = ((h - mu) ** 2).mean(-1, keepdims=True)
            h = (h - mu) / jnp.sqrt(var + LN_EPS) * p[f"ln_g{i}"] + p[f"ln_b{i}"]
        enc = h @ p["enc_wf"].T + p["enc_bf"]
        outputs = {"encoding": enc}
        feats = []
        for ct in CONSTRAINT_TYPES:
            f = enc @ p[f"head_w_{ct}"].T + p[f"head_b_{ct}"]
            outputs[f"{ct}_features"] = f
            feats.append(f)
        outputs["combined_constraints"] = jnp.concatenate(feats, axis=-1)
        for name, _ in PROJ_SPECS:
            outputs[name] = enc @ p[f"proj_w_{name}"].T + p[f"proj_b_{name}"]
    return outputs


# ----------------------------- parameter setup -------------------------------
def init_params(key):
    keys = iter(jax.random.split(key, 64))
    r = lambda shape, s=0.1: jax.random.normal(next(keys), shape, jnp.float32) * s
    p = {}
    in_dim = STATE_DIM
    for i in range(NUM_LAYERS):
        p[f"enc_w{i}"] = r((HIDDEN_DIM, in_dim))
        p[f"enc_b{i}"] = r((HIDDEN_DIM,))
        p[f"ln_g{i}"] = 1.0 + r((HIDDEN_DIM,), 0.05)
        p[f"ln_b{i}"] = r((HIDDEN_DIM,), 0.05)
        in_dim = HIDDEN_DIM
    p["enc_wf"] = r((PHYSICS_DIM, HIDDEN_DIM))
    p["enc_bf"] = r((PHYSICS_DIM,))
    for ct in CONSTRAINT_TYPES:
        p[f"head_w_{ct}"] = r((CONSTRAINT_DIM, PHYSICS_DIM))
        p[f"head_b_{ct}"] = r((CONSTRAINT_DIM,))
    for name, d in PROJ_SPECS:
        p[f"proj_w_{name}"] = r((d, PHYSICS_DIM))
        p[f"proj_b_{name}"] = r((d,))
    return p


if __name__ == "__main__":
    key = jax.random.PRNGKey(0)
    kx, kp = jax.random.split(key)
    state = jax.random.normal(kx, (BATCH, STATE_DIM), jnp.float32)
    params = init_params(kp)

    # One-time weight repack / epilogue folding (out of the per-call path).
    slab_mlp, slab_final = prepare_params(params)

    out = physics_encoder_forward(state, slab_mlp, slab_final)
    out = jax.block_until_ready(out)

    ref = reference_forward(state, params)

    # 5e-3 leaves margin for MXU f32 pass-count differences and the folded
    # epilogue's change in matmul associativity.
    atol = rtol = 5e-3
    assert out["encoding"].shape == (BATCH, PHYSICS_DIM)
    assert out["combined_constraints"].shape == (BATCH, PHYSICS_DIM)
    assert set(out.keys()) == set(ref.keys())
    for k in ref:
        assert out[k].shape == ref[k].shape, f"shape mismatch for {k}"
        assert jnp.allclose(out[k], ref[k], atol=atol, rtol=rtol), f"value mismatch for {k}"
    print("KERNEL_OK")
</pallas_src>

<mosaic_0001>
module attributes {stable_mosaic.version = 11 : i64} {
  func.func @physics_encoder_kernel(%arg0: memref<8x16xf32, #tpu.memory_space<vmem>>, %arg1: memref<96x32xf32, #tpu.memory_space<vmem>>, %arg2: memref<40x128xf32, #tpu.memory_space<vmem>>, %arg3: memref<8x128xf32, #tpu.memory_space<vmem>>) attributes {dimension_semantics = [], scalar_prefetch = 0 : i64, scratch_operands = 0 : i64, tpu.core_type = #tpu.core_type<tc>} {
    %c0 = arith.constant 0 : index
    %c0_0 = arith.constant 0 : index
    %0 = vector.load %arg0[%c0, %c0_0] : memref<8x16xf32, #tpu.memory_space<vmem>>, vector<8x16xf32>
    %c16 = arith.constant 16 : index
    %c0_1 = arith.constant 0 : index
    %1 = vector.load %arg1[%c16, %c0_1] : memref<96x32xf32, #tpu.memory_space<vmem>>, vector<16x32xf32>
    %c0_2 = arith.constant 0 : index
    %c0_3 = arith.constant 0 : index
    %2 = vector.load %arg1[%c0_2, %c0_3] : memref<96x32xf32, #tpu.memory_space<vmem>>, vector<1x32xf32>
    %c1 = arith.constant 1 : index
    %c0_4 = arith.constant 0 : index
    %3 = vector.load %arg1[%c1, %c0_4] : memref<96x32xf32, #tpu.memory_space<vmem>>, vector<1x32xf32>
    %c2 = arith.constant 2 : index
    %c0_5 = arith.constant 0 : index
    %4 = vector.load %arg1[%c2, %c0_5] : memref<96x32xf32, #tpu.memory_space<vmem>>, vector<1x32xf32>
    %cst = arith.constant dense<0.000000e+00> : vector<8x32xf32>
    %5 = tpu.matmul %0, %1, %cst {dimension_numbers = #tpu.dot_dimension_numbers<[1], [0], [0], [1], [0, 0, 1, 1], [], []>} : vector<8x16xf32>, vector<16x32xf32>, vector<8x32xf32> -> vector<8x32xf32>
    %6 = vector.broadcast %2 : vector<1x32xf32> to vector<8x32xf32>
    %7 = arith.addf %5, %6 : vector<8x32xf32>
    %cst_6 = arith.constant 0.000000e+00 : f32
    %8 = vector.broadcast %cst_6 : f32 to vector<8x32xf32>
    %9 = arith.maximumf %7, %8 : vector<8x32xf32>
    %cst_7 = arith.constant dense<0.000000e+00> : vector<8xf32>
    %10 = vector.multi_reduction <add>, %9, %cst_7 [1] : vector<8x32xf32> to vector<8xf32>
    %11 = vector.shape_cast %10 : vector<8xf32> to vector<8x1xf32>
    %12 = arith.mulf %9, %9 : vector<8x32xf32>
    %cst_8 = arith.constant dense<0.000000e+00> : vector<8xf32>
    %13 = vector.multi_reduction <add>, %12, %cst_8 [1] : vector<8x32xf32> to vector<8xf32>
    %14 = vector.shape_cast %13 : vector<8xf32> to vector<8x1xf32>
    %cst_9 = arith.constant 3.125000e-02 : f32
    %15 = vector.broadcast %cst_9 : f32 to vector<8x1xf32>
    %16 = arith.mulf %11, %15 : vector<8x1xf32>
    %cst_10 = arith.constant 3.125000e-02 : f32
    %17 = vector.broadcast %cst_10 : f32 to vector<8x1xf32>
    %18 = arith.mulf %14, %17 : vector<8x1xf32>
    %19 = arith.mulf %16, %16 : vector<8x1xf32>
    %20 = arith.subf %18, %19 : vector<8x1xf32>
    %cst_11 = arith.constant 0.000000e+00 : f32
    %21 = vector.broadcast %cst_11 : f32 to vector<8x1xf32>
    %22 = arith.maximumf %20, %21 : vector<8x1xf32>
    %23 = vector.broadcast %16 : vector<8x1xf32> to vector<8x32xf32>
    %24 = arith.subf %9, %23 : vector<8x32xf32>
    %cst_12 = arith.constant 9.99999974E-6 : f32
    %25 = vector.broadcast %cst_12 : f32 to vector<8x1xf32>
    %26 = arith.addf %22, %25 : vector<8x1xf32>
    %27 = math.rsqrt %26 : vector<8x1xf32>
    %28 = vector.broadcast %27 : vector<8x1xf32> to vector<8x32xf32>
    %29 = arith.mulf %24, %28 : vector<8x32xf32>
    %30 = vector.broadcast %3 : vector<1x32xf32> to vector<8x32xf32>
    %31 = arith.mulf %29, %30 : vector<8x32xf32>
    %32 = vector.broadcast %4 : vector<1x32xf32> to vector<8x32xf32>
    %33 = arith.addf %31, %32 : vector<8x32xf32>
    %c32 = arith.constant 32 : index
    %c0_13 = arith.constant 0 : index
    %34 = vector.load %arg1[%c32, %c0_13] : memref<96x32xf32, #tpu.memory_space<vmem>>, vector<32x32xf32>
    %c3 = arith.constant 3 : index
    %c0_14 = arith.constant 0 : index
    %35 = vector.load %arg1[%c3, %c0_14] : memref<96x32xf32, #tpu.memory_space<vmem>>, vector<1x32xf32>
    %c4 = arith.constant 4 : index
    %c0_15 = arith.constant 0 : index
    %36 = vector.load %arg1[%c4, %c0_15] : memref<96x32xf32, #tpu.memory_space<vmem>>, vector<1x32xf32>
    %c5 = arith.constant 5 : index
    %c0_16 = arith.constant 0 : index
    %37 = vector.load %arg1[%c5, %c0_16] : memref<96x32xf32, #tpu.memory_space<vmem>>, vector<1x32xf32>
    %cst_17 = arith.constant dense<0.000000e+00> : vector<8x32xf32>
    %38 = tpu.matmul %33, %34, %cst_17 {dimension_numbers = #tpu.dot_dimension_numbers<[1], [0], [0], [1], [0, 0, 1, 1], [], []>} : vector<8x32xf32>, vector<32x32xf32>, vector<8x32xf32> -> vector<8x32xf32>
    %39 = vector.broadcast %35 : vector<1x32xf32> to vector<8x32xf32>
    %40 = arith.addf %38, %39 : vector<8x32xf32>
    %cst_18 = arith.constant 0.000000e+00 : f32
    %41 = vector.broadcast %cst_18 : f32 to vector<8x32xf32>
    %42 = arith.maximumf %40, %41 : vector<8x32xf32>
    %cst_19 = arith.constant dense<0.000000e+00> : vector<8xf32>
    %43 = vector.multi_reduction <add>, %42, %cst_19 [1] : vector<8x32xf32> to vector<8xf32>
    %44 = vector.shape_cast %43 : vector<8xf32> to vector<8x1xf32>
    %45 = arith.mulf %42, %42 : vector<8x32xf32>
    %cst_20 = arith.constant dense<0.000000e+00> : vector<8xf32>
    %46 = vector.multi_reduction <add>, %45, %cst_20 [1] : vector<8x32xf32> to vector<8xf32>
    %47 = vector.shape_cast %46 : vector<8xf32> to vector<8x1xf32>
    %cst_21 = arith.constant 3.125000e-02 : f32
    %48 = vector.broadcast %cst_21 : f32 to vector<8x1xf32>
    %49 = arith.mulf %44, %48 : vector<8x1xf32>
    %cst_22 = arith.constant 3.125000e-02 : f32
    %50 = vector.broadcast %cst_22 : f32 to vector<8x1xf32>
    %51 = arith.mulf %47, %50 : vector<8x1xf32>
    %52 = arith.mulf %49, %49 : vector<8x1xf32>
    %53 = arith.subf %51, %52 : vector<8x1xf32>
    %cst_23 = arith.constant 0.000000e+00 : f32
    %54 = vector.broadcast %cst_23 : f32 to vector<8x1xf32>
    %55 = arith.maximumf %53, %54 : vector<8x1xf32>
    %56 = vector.broadcast %49 : vector<8x1xf32> to vector<8x32xf32>
    %57 = arith.subf %42, %56 : vector<8x32xf32>
    %cst_24 = arith.constant 9.99999974E-6 : f32
    %58 = vector.broadcast %cst_24 : f32 to vector<8x1xf32>
    %59 = arith.addf %55, %58 : vector<8x1xf32>
    %60 = math.rsqrt %59 : vector<8x1xf32>
    %61 = vector.broadcast %60 : vector<8x1xf32> to vector<8x32xf32>
    %62 = arith.mulf %57, %61 : vector<8x32xf32>
    %63 = vector.broadcast %36 : vector<1x32xf32> to vector<8x32xf32>
    %64 = arith.mulf %62, %63 : vector<8x32xf32>
    %65 = vector.broadcast %37 : vector<1x32xf32> to vector<8x32xf32>
    %66 = arith.addf %64, %65 : vector<8x32xf32>
    %c64 = arith.constant 64 : index
    %c0_25 = arith.constant 0 : index
    %67 = vector.load %arg1[%c64, %c0_25] : memref<96x32xf32, #tpu.memory_space<vmem>>, vector<32x32xf32>
    %c6 = arith.constant 6 : index
    %c0_26 = arith.constant 0 : index
    %68 = vector.load %arg1[%c6, %c0_26] : memref<96x32xf32, #tpu.memory_space<vmem>>, vector<1x32xf32>
    %c7 = arith.constant 7 : index
    %c0_27 = arith.constant 0 : index
    %69 = vector.load %arg1[%c7, %c0_27] : memref<96x32xf32, #tpu.memory_space<vmem>>, vector<1x32xf32>
    %c8 = arith.constant 8 : index
    %c0_28 = arith.constant 0 : index
    %70 = vector.load %arg1[%c8, %c0_28] : memref<96x32xf32, #tpu.memory_space<vmem>>, vector<1x32xf32>
    %cst_29 = arith.constant dense<0.000000e+00> : vector<8x32xf32>
    %71 = tpu.matmul %66, %67, %cst_29 {dimension_numbers = #tpu.dot_dimension_numbers<[1], [0], [0], [1], [0, 0, 1, 1], [], []>} : vector<8x32xf32>, vector<32x32xf32>, vector<8x32xf32> -> vector<8x32xf32>
    %72 = vector.broadcast %68 : vector<1x32xf32> to vector<8x32xf32>
    %73 = arith.addf %71, %72 : vector<8x32xf32>
    %cst_30 = arith.constant 0.000000e+00 : f32
    %74 = vector.broadcast %cst_30 : f32 to vector<8x32xf32>
    %75 = arith.maximumf %73, %74 : vector<8x32xf32>
    %cst_31 = arith.constant dense<0.000000e+00> : vector<8xf32>
    %76 = vector.multi_reduction <add>, %75, %cst_31 [1] : vector<8x32xf32> to vector<8xf32>
    %77 = vector.shape_cast %76 : vector<8xf32> to vector<8x1xf32>
    %78 = arith.mulf %75, %75 : vector<8x32xf32>
    %cst_32 = arith.constant dense<0.000000e+00> : vector<8xf32>
    %79 = vector.multi_reduction <add>, %78, %cst_32 [1] : vector<8x32xf32> to vector<8xf32>
    %80 = vector.shape_cast %79 : vector<8xf32> to vector<8x1xf32>
    %cst_33 = arith.constant 3.125000e-02 : f32
    %81 = vector.broadcast %cst_33 : f32 to vector<8x1xf32>
    %82 = arith.mulf %77, %81 : vector<8x1xf32>
    %cst_34 = arith.constant 3.125000e-02 : f32
    %83 = vector.broadcast %cst_34 : f32 to vector<8x1xf32>
    %84 = arith.mulf %80, %83 : vector<8x1xf32>
    %85 = arith.mulf %82, %82 : vector<8x1xf32>
    %86 = arith.subf %84, %85 : vector<8x1xf32>
    %cst_35 = arith.constant 0.000000e+00 : f32
    %87 = vector.broadcast %cst_35 : f32 to vector<8x1xf32>
    %88 = arith.maximumf %86, %87 : vector<8x1xf32>
    %89 = vector.broadcast %82 : vector<8x1xf32> to vector<8x32xf32>
    %90 = arith.subf %75, %89 : vector<8x32xf32>
    %cst_36 = arith.constant 9.99999974E-6 : f32
    %91 = vector.broadcast %cst_36 : f32 to vector<8x1xf32>
    %92 = arith.addf %88, %91 : vector<8x1xf32>
    %93 = math.rsqrt %92 : vector<8x1xf32>
    %94 = vector.broadcast %93 : vector<8x1xf32> to vector<8x32xf32>
    %95 = arith.mulf %90, %94 : vector<8x32xf32>
    %96 = vector.broadcast %69 : vector<1x32xf32> to vector<8x32xf32>
    %97 = arith.mulf %95, %96 : vector<8x32xf32>
    %98 = vector.broadcast %70 : vector<1x32xf32> to vector<8x32xf32>
    %99 = arith.addf %97, %98 : vector<8x32xf32>
    %c0_37 = arith.constant 0 : index
    %c0_38 = arith.constant 0 : index
    %100 = vector.load %arg2[%c0_37, %c0_38] : memref<40x128xf32, #tpu.memory_space<vmem>>, vector<32x128xf32>
    %c32_39 = arith.constant 32 : index
    %c0_40 = arith.constant 0 : index
    %101 = vector.load %arg2[%c32_39, %c0_40] : memref<40x128xf32, #tpu.memory_space<vmem>>, vector<1x128xf32>
    %cst_41 = arith.constant dense<0.000000e+00> : vector<8x128xf32>
    %102 = tpu.matmul %99, %100, %cst_41 {dimension_numbers = #tpu.dot_dimension_numbers<[1], [0], [0], [1], [0, 0, 1, 1], [], []>} : vector<8x32xf32>, vector<32x128xf32>, vector<8x128xf32> -> vector<8x128xf32>
    %103 = vector.broadcast %101 : vector<1x128xf32> to vector<8x128xf32>
    %104 = arith.addf %102, %103 : vector<8x128xf32>
    %c0_42 = arith.constant 0 : index
    %c0_43 = arith.constant 0 : index
    %105 = vector.load %arg3[%c0_42, %c0_43] : memref<8x128xf32, #tpu.memory_space<vmem>>, vector<8x128xf32>
    tpu.vector_store %arg3[%c0_42, %c0_43], %104 {strides = array<i32>} : memref<8x128xf32, #tpu.memory_space<vmem>>, vector<8x128xf32>,
    return
  }
}

</mosaic_0001>

<bundles_post_ra>
// kernel: physics_encoder_forward.1
= control target key start
LH: loop header
LB: loop body
LE: loop exit
PB: predicated region body
PF: predicated region fallthrough
CT: control target
= control target key end

     0   :  { %vm21_vm0 = vcmask 130048   ;;  %vm46_vm1 = vcmask 261120   ;;  %s359_s1 = inlined_call_operand.vmem [shape: f32[96,32], index: 1, kind: input, shape index: {}]   ;;  %s360_s0 = inlined_call_operand.vmem [shape: f32[8,16], index: 0, kind: input, shape index: {}]   ;;  %s361_s2 = inlined_call_operand.vmem [shape: f32[40,128], index: 2, kind: input, shape index: {}]   ;;  %s362_s3 = inlined_call_operand.vmem [shape: f32[8,128], index: 3, kind: output, shape index: {}]  }
   0x1   :  { %v16_v0 = vld [vmem:[%s359_s1 + $0x18] sm:$0xff]  ;;  %v15_v1 = vld [vmem:[%s359_s1 + $0x10] sm:$0xff]  ;;  %v14_v2 = vld [vmem:[%s360_s0] sm:$0xff] }
   0x2   :  { %39 = vmatpush.msra.mxu0 %v16_v0  ;;  %v236_v3 = vld [vmem:[%s359_s1] ss:$0 sm:$0xff]  ;;  %v79_v11 = vld [vmem:[%s359_s1 + $0x38] sm:$0xff]  ;;  %v78_v12 = vld [vmem:[%s359_s1 + $0x30] sm:$0xff] }
   0x3   :  { %99 = vmatpush.msra.mxu1 %v79_v11  ;;  %v77_v13 = vld [vmem:[%s359_s1 + $0x28] sm:$0xff]  ;;  %v76_v14 = vld [vmem:[%s359_s1 + $0x20] sm:$0xff]  ;;  %v140_v43 = vld [vmem:[%s359_s1 + $0x58] sm:$0xff] }
   0x4   :  { %40 = vmatpush.msra.mxu0 %v15_v1  ;;  %v237_v29 = vld [vmem:[%s359_s1 + $0x1] ss:$0 sm:$0xff]  ;;  %v238_v32 = vld [vmem:[%s359_s1 + $0x2] ss:$0 sm:$0xff]  ;;  %v239_v35 = vld [vmem:[%s359_s1 + $0x3] ss:$0 sm:$0xff]  ;;  %160 = vmatpush.msra.mxu2 %v140_v43 }
   0x5   :  { %232 = vmatmul.msk.f32.vlgmr.msra.gmra.mxu0 %vm21_vm0, %v14_v2  ;;  %100 = vmatpush.msra.mxu1 %v78_v12  ;;  %v139_v44 = vld [vmem:[%s359_s1 + $0x50] sm:$0xff]  ;;  %v138_v45 = vld [vmem:[%s359_s1 + $0x48] sm:$0xff]  ;;  %v137_v46 = vld [vmem:[%s359_s1 + $0x40] sm:$0xff] }
   0x6   :  { %161 = vmatpush.msra.mxu2 %v139_v44  ;;  %v240_v61 = vld [vmem:[%s359_s1 + $0x4] ss:$0 sm:$0xff]  ;;  %v241_v0 = vld [vmem:[%s359_s1 + $0x5] ss:$0 sm:$0xff]  ;;  %v201_v11 = vld [vmem:[%s361_s2 + $0x18] sm:$0xff] }
   0x7   :  { %101 = vmatpush.msra.mxu1 %v77_v13  ;;  %v200_v12 = vld [vmem:[%s361_s2 + $0x10] sm:$0xff]  ;;  %219 = vmatpush.msra.mxu3 %v201_v11  ;;  %v199_v13 = vld [vmem:[%s361_s2 + $0x8] sm:$0xff] }
   0x8   :  { %162 = vmatpush.msra.mxu2 %v138_v45 }
   0x9   :  { %102 = vmatpush.msra.mxu1 %v76_v14  ;;  %220 = vmatpush.msra.mxu3 %v200_v12  ;;  %v198_v14 = vld [vmem:[%s361_s2] sm:$0xff] }
   0xa   :  { %163 = vmatpush.msra.mxu2 %v137_v46 }
   0xb   :  { %221 = vmatpush.msra.mxu3 %v199_v13 }
   0xd   :  { %222 = vmatpush.msra.mxu3 %v198_v14 }
  0x82   :  { %v42_v4 = vpop.f32.mrf.mxu0 }
  0x83   :  { %v43_v5 = vadd.f32 %v236_v3, %v42_v4  ;;  %v242_v3 = vld [vmem:[%s359_s1 + $0x6] ss:$0 sm:$0xff] }
  0x85   :  { %v45_v6 = vmax.f32 %v43_v5, 0.0 }
  0x87   :  { %v47_v7 = vsel %vm46_vm1, %v45_v6, 0.0  ;;  %v50_v8 = vmul.f32 %v45_v6, %v45_v6 }
  0x88   :  { %48 = vadd.xlane.f32.xlu0 %v47_v7 }
  0x89   :  { %v51_v9 = vsel %vm46_vm1, %v50_v8, 0.0 }
  0x90   :  { %52 = vadd.xlane.f32.xlu0 %v51_v9 }
  0xfb   :  { %v49_v10 = vpop.xlane.xlu0 %48 }
  0xfc   :  { %v54_v15 = vmul.f32 0.03125, %v49_v10 }
  0xfe   :  { %v56_v17 = vmul.f32 %v54_v15, %v54_v15  ;;  %v59_v28 = vsub.f32 %v45_v6, %v54_v15 }
 0x103   :  { %v53_v16 = vpop.xlane.xlu0 %52 }
 0x104   :  { %v55_v18 = vmul.f32 0.03125, %v53_v16 }
 0x106   :  { %v57_v19 = vsub.f32 %v55_v18, %v56_v17 }
 0x108   :  { %v58_v20 = vmax.f32 %v57_v19, 0.0 }
 0x10a   :  { %v60_v21 = vadd.f32 1e-05, %v58_v20 }
 0x10c   :  { %246 = vrsqrt.f32 %v60_v21  ;;  %vm67_vm3 = vweird.f32 %v60_v21 }
 0x112   :  { %v247_v22 = vpop.eup %246 }
 0x113   :  { %v62_v23 = vmul.f32 %v247_v22, %v60_v21  ;;  %vm68_vm2 = vweird.f32 %v247_v22 }
 0x114   :  { %vm69_vm4 = vmor %vm67_vm3, %vm68_vm2 }
 0x115   :  { %v63_v24 = vmul.f32 %v247_v22, %v62_v23 }
 0x117   :  { %v64_v25 = vmul.f32 0.5, %v63_v24 }
 0x119   :  { %v65_v26 = vsub.f32 1.5, %v64_v25 }
 0x11b   :  { %v66_v27 = vmul.f32 %v247_v22, %v65_v26 }
 0x11d   :  { %v70_v30 = vsel %vm69_vm4, %v247_v22, %v66_v27 }
 0x11e   :  { %v71_v31 = vmul.f32 %v70_v30, %v59_v28 }
 0x120   :  { %v73_v33 = vmul.f32 %v237_v29, %v71_v31  ;;  %v243_v29 = vld [vmem:[%s359_s1 + $0x7] ss:$0 sm:$0xff] }
 0x122   :  { %v75_v34 = vadd.f32 %v238_v32, %v73_v33  ;;  %v244_v32 = vld [vmem:[%s359_s1 + $0x8] ss:$0 sm:$0xff] }
 0x124   :  { %233 = vmatmul.msk.f32.vlgmr.msra.gmra.mxu1 %vm46_vm1, %v75_v34 }
 0x1a1   :  { %v104_v36 = vpop.f32.mrf.mxu1 }
 0x1a2   :  { %v105_v37 = vadd.f32 %v239_v35, %v104_v36  ;;  %v245_v35 = vld [vmem:[%s361_s2 + $0x20] ss:$0 sm:$0xff] }
 0x1a4   :  { %v107_v38 = vmax.f32 %v105_v37, 0.0 }
 0x1a6   :  { %v108_v39 = vsel %vm46_vm1, %v107_v38, 0.0  ;;  %v111_v40 = vmul.f32 %v107_v38, %v107_v38 }
 0x1a7   :  { %109 = vadd.xlane.f32.xlu1 %v108_v39 }
 0x1a8   :  { %v112_v41 = vsel %vm46_vm1, %v111_v40, 0.0 }
 0x1af   :  { %113 = vadd.xlane.f32.xlu1 %v112_v41 }
 0x21a   :  { %v110_v42 = vpop.xlane.xlu1 %109 }
 0x21b   :  { %v115_v47 = vmul.f32 0.03125, %v110_v42 }
 0x21d   :  { %v117_v49 = vmul.f32 %v115_v47, %v115_v47  ;;  %v120_v60 = vsub.f32 %v107_v38, %v115_v47 }
 0x222   :  { %v114_v48 = vpop.xlane.xlu1 %113 }
 0x223   :  { %v116_v50 = vmul.f32 0.03125, %v114_v48 }
 0x225   :  { %v118_v51 = vsub.f32 %v116_v50, %v117_v49 }
 0x227   :  { %v119_v52 = vmax.f32 %v118_v51, 0.0 }
 0x229   :  { %v121_v53 = vadd.f32 1e-05, %v119_v52 }
 0x22b   :  { %248 = vrsqrt.f32 %v121_v53  ;;  %vm128_vm6 = vweird.f32 %v121_v53 }
 0x231   :  { %v249_v54 = vpop.eup %248 }
 0x232   :  { %v123_v55 = vmul.f32 %v249_v54, %v121_v53  ;;  %vm129_vm5 = vweird.f32 %v249_v54 }
 0x233   :  { %vm130_vm7 = vmor %vm128_vm6, %vm129_vm5 }
 0x234   :  { %v124_v56 = vmul.f32 %v249_v54, %v123_v55 }
 0x236   :  { %v125_v57 = vmul.f32 0.5, %v124_v56 }
 0x238   :  { %v126_v58 = vsub.f32 1.5, %v125_v57 }
 0x23a   :  { %v127_v59 = vmul.f32 %v249_v54, %v126_v58 }
 0x23c   :  { %v131_v62 = vsel %vm130_vm7, %v249_v54, %v127_v59 }
 0x23d   :  { %v132_v63 = vmul.f32 %v131_v62, %v120_v60 }
 0x23f   :  { %v134_v1 = vmul.f32 %v240_v61, %v132_v63 }
 0x241   :  { %v136_v2 = vadd.f32 %v241_v0, %v134_v1 }
 0x243   :  { %234 = vmatmul.msk.f32.vlgmr.msra.gmra.mxu2 %vm46_vm1, %v136_v2 }
 0x2c6   :  { %v165_v4 = vpop.f32.mrf.mxu2 }
 0x2c7   :  { %v166_v5 = vadd.f32 %v242_v3, %v165_v4 }
 0x2c9   :  { %v168_v6 = vmax.f32 %v166_v5, 0.0 }
 0x2cb   :  { %v169_v7 = vsel %vm46_vm1, %v168_v6, 0.0  ;;  %v172_v8 = vmul.f32 %v168_v6, %v168_v6 }
 0x2cc   :  { %170 = vadd.xlane.f32.xlu2 %v169_v7 }
 0x2cd   :  { %v173_v9 = vsel %vm46_vm1, %v172_v8, 0.0 }
 0x2d4   :  { %174 = vadd.xlane.f32.xlu2 %v173_v9 }
 0x33f   :  { %v171_v10 = vpop.xlane.xlu2 %170 }
 0x340   :  { %v176_v15 = vmul.f32 0.03125, %v171_v10 }
 0x342   :  { %v178_v17 = vmul.f32 %v176_v15, %v176_v15  ;;  %v181_v28 = vsub.f32 %v168_v6, %v176_v15 }
 0x347   :  { %v175_v16 = vpop.xlane.xlu2 %174 }
 0x348   :  { %v177_v18 = vmul.f32 0.03125, %v175_v16 }
 0x34a   :  { %v179_v19 = vsub.f32 %v177_v18, %v178_v17 }
 0x34c   :  { %v180_v20 = vmax.f32 %v179_v19, 0.0 }
 0x34e   :  { %v182_v21 = vadd.f32 1e-05, %v180_v20 }
 0x350   :  { %250 = vrsqrt.f32 %v182_v21  ;;  %vm189_vm9 = vweird.f32 %v182_v21 }
 0x356   :  { %v251_v22 = vpop.eup %250 }
 0x357   :  { %v184_v23 = vmul.f32 %v251_v22, %v182_v21  ;;  %vm190_vm8 = vweird.f32 %v251_v22 }
 0x358   :  { %vm191_vm10 = vmor %vm189_vm9, %vm190_vm8 }
 0x359   :  { %v185_v24 = vmul.f32 %v251_v22, %v184_v23 }
 0x35b   :  { %v186_v25 = vmul.f32 0.5, %v185_v24 }
 0x35d   :  { %v187_v26 = vsub.f32 1.5, %v186_v25 }
 0x35f   :  { %v188_v27 = vmul.f32 %v251_v22, %v187_v26 }
 0x361   :  { %v192_v30 = vsel %vm191_vm10, %v251_v22, %v188_v27 }
 0x362   :  { %v193_v31 = vmul.f32 %v192_v30, %v181_v28 }
 0x364   :  { %v195_v33 = vmul.f32 %v243_v29, %v193_v31 }
 0x366   :  { %v197_v34 = vadd.f32 %v244_v32, %v195_v33 }
 0x368   :  { %235 = vmatmul.msk.f32.vlgmr.msra.gmra.mxu3 %vm46_vm1, %v197_v34 }
 0x3eb   :  { %v224_v36 = vpop.f32.mrf.mxu3 }
 0x3ec   :  { %v225_v37 = vadd.f32 %v245_v35, %v224_v36 }
 0x3ee   :  { %227 = vst [vmem:[%s362_s3] sm:$0xff] %v225_v37 }

</bundles_post_ra>
